<compile_context>
chip_gen: v5e
topology: v5e:2x2
jax: 0.10.0
libtpu: 0.0.40
codegen_flags: <defaults>
</compile_context>

<pallas_src>
import math

import jax
import jax.numpy as jnp
from jax.experimental import pallas as pl
from jax.experimental.pallas import tpu as pltpu


def _padding(shape1, shape2):
    """Exact port of PadToAgree.padding (torch F.pad order: [hL, hR, wL, wR])."""
    have_w, have_h = shape1[-2:]
    want_w, want_h = shape2[-2:]
    half_offw = (want_w - have_w) / 2
    half_offh = (want_h - have_h) / 2
    return [
        math.floor(half_offh),
        math.ceil(half_offh),
        math.floor(half_offw),
        math.ceil(half_offw),
    ]


def _overlap(W1, H1, W2, H2, pw_l, ph_l):
    """Static overlap window between the (shifted) input plane and the output."""
    ows, iws = max(0, pw_l), max(0, -pw_l)
    wl = min(W1 - iws, W2 - ows)
    ohs, ihs = max(0, ph_l), max(0, -ph_l)
    hl = min(H1 - ihs, H2 - ohs)
    return iws, ihs, ows, ohs, wl, hl


def _round_up(x, m):
    return (x + m - 1) // m * m


def _plane_vmem_bytes(w, h, dtype):
    itemsize = jnp.dtype(dtype).itemsize
    sublane = max(8, 32 // itemsize)          # packed-dtype sublane multiple
    return _round_up(w, sublane) * _round_up(h, 128) * itemsize


def _pick_channel_block(nc, bytes_per_channel, budget=2 * 1024 * 1024):
    """Largest divisor of nc whose per-step VMEM block stays under `budget`."""
    tc = 1
    for d in range(1, nc + 1):
        if nc % d == 0 and d * bytes_per_channel <= budget:
            tc = d
    return tc


def _make_crop_dma_kernel(tc, iws, ihs, W2, H2):
    """Pure-crop: DMA the overlap window straight from HBM into the out tile."""
    def kernel(x_hbm, o_ref, sem):
        i = pl.program_id(0)
        cp = pltpu.make_async_copy(
            x_hbm.at[pl.ds(i * tc, tc), pl.ds(iws, W2), pl.ds(ihs, H2)],
            o_ref,
            sem,
        )
        cp.start()
        cp.wait()
    return kernel


def _make_copy_kernel(tc, W2, H2, iws, ihs, ows, ohs, wl, hl, zero_border):
    """Generic pad/crop kernel on auto-pipelined VMEM tiles (borders zeroed only)."""
    def kernel(x_ref, o_ref):
        # x_ref: (tc, W1, H1), o_ref: (tc, W2, H2)
        if wl <= 0 or hl <= 0:                       # no overlap at all
            o_ref[...] = jnp.zeros_like(o_ref)
            return
        if zero_border:
            if ows > 0:
                o_ref[:, :ows, :] = jnp.zeros((tc, ows, H2), o_ref.dtype)
            if ows + wl < W2:
                o_ref[:, ows + wl:, :] = jnp.zeros((tc, W2 - ows - wl, H2), o_ref.dtype)
            if ohs > 0:
                o_ref[:, ows:ows + wl, :ohs] = jnp.zeros((tc, wl, ohs), o_ref.dtype)
            if ohs + hl < H2:
                o_ref[:, ows:ows + wl, ohs + hl:] = jnp.zeros((tc, wl, H2 - ohs - hl), o_ref.dtype)
        o_ref[:, ows:ows + wl, ohs:ohs + hl] = x_ref[:, iws:iws + wl, ihs:ihs + hl]
    return kernel


def pad_to_agree(inputs1, inputs2):
    """Pallas implementation of PadToAgree.forward (NCHW)."""
    N, C, W1, H1 = inputs1.shape
    ph_l, ph_r, pw_l, pw_r = _padding(inputs1.shape, inputs2.shape)
    W2 = W1 + pw_l + pw_r
    H2 = H1 + ph_l + ph_r
    assert (W2, H2) == tuple(inputs2.shape[-2:])

    iws, ihs, ows, ohs, wl, hl = _overlap(W1, H1, W2, H2, pw_l, ph_l)
    full_cover = (ows == 0 and ohs == 0 and wl == W2 and hl == H2)

    NC = N * C
    dtype = inputs1.dtype
    x = inputs1.reshape(NC, W1, H1)                 # free: contiguous NCHW

    per_channel = _plane_vmem_bytes(W1, H1, dtype) + _plane_vmem_bytes(W2, H2, dtype)
    tc = _pick_channel_block(NC, per_channel)
    grid = (NC // tc,)

    cparams = pltpu.CompilerParams(
        dimension_semantics=("parallel",),          # shard grid across v7x's 2 TCs
        vmem_limit_bytes=32 * 1024 * 1024,          # blocks are sized << this
    )
    out_shape = jax.ShapeDtypeStruct((NC, W2, H2), dtype)
    out_spec = pl.BlockSpec((tc, W2, H2), lambda i: (i, 0, 0))

    out = None
    if full_cover:
        # Fast path: crop applied in the DMA itself (no VPU/XLU work, no overfetch).
        try:
            out = pl.pallas_call(
                _make_crop_dma_kernel(tc, iws, ihs, W2, H2),
                out_shape=out_shape,
                grid_spec=pltpu.PrefetchScalarGridSpec(
                    num_scalar_prefetch=0,
                    grid=grid,
                    in_specs=[pl.BlockSpec(memory_space=pl.ANY)],
                    out_specs=out_spec,
                    scratch_shapes=[pltpu.SemaphoreType.DMA],
                ),
                compiler_params=cparams,
            )(x)
        except Exception:
            out = None                              # fall back to generic kernel

    if out is None:
        out = pl.pallas_call(
            _make_copy_kernel(tc, W2, H2, iws, ihs, ows, ohs, wl, hl,
                              zero_border=not full_cover),
            out_shape=out_shape,
            grid_spec=pltpu.PrefetchScalarGridSpec(
                num_scalar_prefetch=0,
                grid=grid,
                in_specs=[pl.BlockSpec((tc, W1, H1), lambda i: (i, 0, 0))],
                out_specs=out_spec,
            ),
            compiler_params=cparams,
        )(x)

    return out.reshape(N, C, W2, H2)


def _reference(inputs1, inputs2):
    """Pure-JAX reference of torch F.pad with (possibly negative) padding."""
    N, C, W1, H1 = inputs1.shape
    ph_l, ph_r, pw_l, pw_r = _padding(inputs1.shape, inputs2.shape)
    W2, H2 = W1 + pw_l + pw_r, H1 + ph_l + ph_r
    iws, ihs, ows, ohs, wl, hl = _overlap(W1, H1, W2, H2, pw_l, ph_l)
    out = jnp.zeros((N, C, W2, H2), inputs1.dtype)
    if wl > 0 and hl > 0:
        out = out.at[:, :, ows:ows + wl, ohs:ohs + hl].set(
            inputs1[:, :, iws:iws + wl, ihs:ihs + hl])
    return out


if __name__ == "__main__":
    key = jax.random.PRNGKey(0)
    k1, k2, k3 = jax.random.split(key, 3)

    # 1) U-Net skip-connection case: crop (inputs1 spatially larger).
    x1 = jax.random.normal(k1, (2, 4, 16, 16), dtype=jnp.float32)
    x2 = jax.random.normal(k2, (2, 4, 12, 12), dtype=jnp.float32)
    out = jax.block_until_ready(pad_to_agree(x1, x2))
    assert out.shape == (2, 4, 12, 12), out.shape
    assert jnp.allclose(out, _reference(x1, x2)), "crop case mismatch"

    # 2) Zero-pad case: inputs1 spatially smaller.
    x3 = jax.random.normal(k3, (2, 4, 12, 12), dtype=jnp.float32)
    out2 = jax.block_until_ready(pad_to_agree(x3, x1))
    assert out2.shape == (2, 4, 16, 16), out2.shape
    assert jnp.allclose(out2, _reference(x3, x1)), "pad case mismatch"

    # 3) Asymmetric odd-offset crop (exercises the floor/ceil split).
    x4 = jax.random.normal(k1, (1, 2, 13, 17), dtype=jnp.float32)
    x5 = jax.random.normal(k2, (1, 2, 8, 8), dtype=jnp.float32)
    out3 = jax.block_until_ready(pad_to_agree(x4, x5))
    assert out3.shape == (1, 2, 8, 8), out3.shape
    assert jnp.allclose(out3, _reference(x4, x5)), "asymmetric crop mismatch"

    print("KERNEL_OK")
</pallas_src>

<mosaic_0001>
module attributes {stable_mosaic.version = 11 : i64} {
  func.func @kernel(%arg0: i32, %arg1: memref<8x16x16xf32, #tpu.memory_space<any>>, %arg2: memref<8x12x12xf32, #tpu.memory_space<vmem>>, %arg3: memref<!tpu.dma_semaphore, #tpu.memory_space<semaphore_mem>>) attributes {dimension_semantics = [#tpu.dimension_semantics<parallel>], iteration_bounds = array<i64: 1>, scalar_prefetch = 0 : i64, scratch_operands = 1 : i64, tpu.core_type = #tpu.core_type<tc>, window_params = [{}, {transform_indices = @transform_1, window_bounds = array<i64: 8, 12, 12>}]} {
    %c8_i32 = arith.constant 8 : i32
    %0 = arith.muli %arg0, %c8_i32 : i32
    %c2_i32 = arith.constant 2 : i32
    %c2_i32_0 = arith.constant 2 : i32
    %1 = tpu.memref_slice %arg1[%0, %c2_i32, %c2_i32_0] : memref<8x16x16xf32, #tpu.memory_space<any>> -> memref<8x12x12xf32, #tpu.memory_space<any>>
    tpu.enqueue_dma source(%1 : memref<8x12x12xf32, #tpu.memory_space<any>>) target(%arg2 : memref<8x12x12xf32, #tpu.memory_space<vmem>>) target_semaphore(%arg3 : memref<!tpu.dma_semaphore, #tpu.memory_space<semaphore_mem>>)
    %c2_i32_1 = arith.constant 2 : i32
    %c2_i32_2 = arith.constant 2 : i32
    %2 = tpu.memref_slice %arg1[%0, %c2_i32_1, %c2_i32_2] : memref<8x16x16xf32, #tpu.memory_space<any>> -> memref<8x12x12xf32, #tpu.memory_space<any>>
    tpu.wait_dma2 semaphore(%arg3 : memref<!tpu.dma_semaphore, #tpu.memory_space<semaphore_mem>>) src(%2 : memref<8x12x12xf32, #tpu.memory_space<any>>) dst(%arg2 : memref<8x12x12xf32, #tpu.memory_space<vmem>>)
    return
  }
  func.func @transform_1(%arg0: i32) -> (i32, i32, i32) {
    %c0_i32 = arith.constant 0 : i32
    %c0_i32_0 = arith.constant 0 : i32
    %c0_i32_1 = arith.constant 0 : i32
    return %arg0, %c0_i32, %c0_i32_0 : i32, i32, i32
  }
}

module attributes {stable_mosaic.version = 11 : i64} {
  func.func @kernel(%arg0: i32, %arg1: memref<8x16x16xf32, #tpu.memory_space<vmem>>, %arg2: memref<8x12x12xf32, #tpu.memory_space<vmem>>) attributes {dimension_semantics = [#tpu.dimension_semantics<parallel>], iteration_bounds = array<i64: 1>, scalar_prefetch = 0 : i64, scratch_operands = 0 : i64, tpu.core_type = #tpu.core_type<tc>, window_params = [{transform_indices = @transform_0, window_bounds = array<i64: 8, 16, 16>}, {transform_indices = @transform_1, window_bounds = array<i64: 8, 12, 12>}]} {
    %c0 = arith.constant 0 : index
    %c2 = arith.constant 2 : index
    %c2_0 = arith.constant 2 : index
    %0 = vector.load %arg1[%c0, %c2, %c2_0] : memref<8x16x16xf32, #tpu.memory_space<vmem>>, vector<8x12x12xf32>
    %c0_1 = arith.constant 0 : index
    %c0_2 = arith.constant 0 : index
    %c0_3 = arith.constant 0 : index
    %1 = vector.load %arg2[%c0_1, %c0_2, %c0_3] : memref<8x12x12xf32, #tpu.memory_space<vmem>>, vector<8x12x12xf32>
    tpu.vector_store %arg2[%c0_1, %c0_2, %c0_3], %0 {strides = array<i32>} : memref<8x12x12xf32, #tpu.memory_space<vmem>>, vector<8x12x12xf32>,
    return
  }
  func.func @transform_0(%arg0: i32) -> (i32, i32, i32) {
    %c0_i32 = arith.constant 0 : i32
    %c0_i32_0 = arith.constant 0 : i32
    %c0_i32_1 = arith.constant 0 : i32
    return %arg0, %c0_i32, %c0_i32_0 : i32, i32, i32
  }
  func.func @transform_1(%arg0: i32) -> (i32, i32, i32) {
    %c0_i32 = arith.constant 0 : i32
    %c0_i32_0 = arith.constant 0 : i32
    %c0_i32_1 = arith.constant 0 : i32
    return %arg0, %c0_i32, %c0_i32_0 : i32, i32, i32
  }
}

</mosaic_0001>

<bundles_post_ra>
// kernel: tpu_custom_call.1
= control target key start
LH: loop header
LB: loop body
LE: loop exit
PB: predicated region body
PF: predicated region fallthrough
CT: control target
= control target key end

     0   :  { %6 = vsyncpa [#allocation3], 0  ;;  %s157_s9 = smov [#allocation2]   ;;  %s158_s11 = smov 128   ;;  %s238_s0 = inlined_call_operand.hbm [shape: f32[8,16,16], index: 0, kind: input, shape index: {}]   ;;  %s239_s1 = inlined_call_operand.vmem [shape: f32[8,12,12], index: 1, kind: output, shape index: {}]  }
   0x1   :  { %s11_s8 = sshll.u32 %s238_s0, 4  ;;  %s13_s10 = sshll.u32 %s157_s9, 4  ;;  %s12_s8 = int_to_ptr.hbm [resolvable:$true] %s11_s8  ;;  %s14_s10 = int_to_ptr.vmem [resolvable:$true] %s13_s10 }
   0x2   :  { %s159_s12 = smov 8  }
   0x3   :  { %19 = dma.hbm_to_vmem [thread:$0]  %s12_s8, 2048, %s14_s10, [#allocation3], %s158_s11, %s158_s11, %s159_s12  }
   0x4   :  { %155 = dma.done.wait [#allocation3], 2048  }
   0x5   :  { %156 = vsyncadd [#allocation3], 4294965248  ;;  %v24_v0 = vld [vmem:[#allocation2 + $0x2] sm:$0xff]  ;;  %v26_v1 = vld [vmem:[#allocation2 + $0x12] sm:$0xff]  ;;  %s160_s13 = smov 126   ;;  %vm104_vm0 = vcmask 97280  }
   0x6   :  { %56 = vrot.lane.b32.xlu0 %v24_v0, %s160_s13  ;;  %60 = vrot.lane.b32.xlu1 %v26_v1, %s160_s13  ;;  %v28_v2 = vld [vmem:[#allocation2 + $0x22] sm:$0xff]  ;;  %v25_v3 = vld [vmem:[#allocation2 + $0xa] sm:$0xf]  ;;  %v27_v4 = vld [vmem:[#allocation2 + $0x1a] sm:$0xf]  ;;  %vm106_vm1 = vcmask 93184  }
   0x7   :  { %64 = vrot.lane.b32.xlu2 %v28_v2, %s160_s13  ;;  %v29_v5 = vld [vmem:[#allocation2 + $0x2a] sm:$0xf]  ;;  %v30_v6 = vld [vmem:[#allocation2 + $0x32] sm:$0xff]  ;;  %v31_v7 = vld [vmem:[#allocation2 + $0x3a] sm:$0xf] }
   0x8   :  { %v32_v8 = vld [vmem:[#allocation2 + $0x42] sm:$0xff]  ;;  %v33_v9 = vld [vmem:[#allocation2 + $0x4a] sm:$0xf]  ;;  %v34_v10 = vld [vmem:[#allocation2 + $0x52] sm:$0xff] }
   0x9   :  { %v35_v11 = vld [vmem:[#allocation2 + $0x5a] sm:$0xf]  ;;  %v36_v12 = vld [vmem:[#allocation2 + $0x62] sm:$0xff]  ;;  %v37_v13 = vld [vmem:[#allocation2 + $0x6a] sm:$0xf] }
   0xa   :  { %v38_v14 = vld [vmem:[#allocation2 + $0x72] sm:$0xff]  ;;  %v39_v15 = vld [vmem:[#allocation2 + $0x7a] sm:$0xf] }
   0xe   :  { %58 = vrot.lane.b32.xlu0 %v25_v3, %s160_s13  ;;  %62 = vrot.lane.b32.xlu1 %v27_v4, %s160_s13 }
   0xf   :  { %66 = vrot.lane.b32.xlu2 %v29_v5, %s160_s13 }
  0x16   :  { %68 = vrot.lane.b32.xlu0 %v30_v6, %s160_s13  ;;  %70 = vrot.lane.b32.xlu1 %v31_v7, %s160_s13 }
  0x17   :  { %72 = vrot.lane.b32.xlu2 %v32_v8, %s160_s13 }
  0x1e   :  { %74 = vrot.lane.b32.xlu0 %v33_v9, %s160_s13  ;;  %76 = vrot.lane.b32.xlu1 %v34_v10, %s160_s13 }
  0x1f   :  { %78 = vrot.lane.b32.xlu2 %v35_v11, %s160_s13 }
  0x26   :  { %80 = vrot.lane.b32.xlu0 %v36_v12, %s160_s13  ;;  %82 = vrot.lane.b32.xlu1 %v37_v13, %s160_s13 }
  0x27   :  { %84 = vrot.lane.b32.xlu2 %v38_v14, %s160_s13 }
  0x2e   :  { %86 = vrot.lane.b32.xlu0 %v39_v15, %s160_s13 }
  0x61   :  { %v65_v16 = vpop.permute.xlu2 %64 }
  0x62   :  { %110 = vst.msk [vmem:[%s239_s1 + $0x20] sm:$0xff] %vm104_vm0, %v65_v16 }
  0x69   :  { %v67_v17 = vpop.permute.xlu2 %66 }
  0x6a   :  { %111 = vst.msk [vmem:[%s239_s1 + $0x28] sm:$0xf] %vm106_vm1, %v67_v17 }
  0x71   :  { %v73_v18 = vpop.permute.xlu2 %72 }
  0x72   :  { %114 = vst.msk [vmem:[%s239_s1 + $0x40] sm:$0xff] %vm104_vm0, %v73_v18 }
  0x78   :  { %v57_v19 = vpop.permute.xlu0 %56  ;;  %v61_v20 = vpop.permute.xlu1 %60 }
  0x79   :  { %105 = vst.msk [vmem:[%s239_s1] sm:$0xff] %vm104_vm0, %v57_v19  ;;  %v79_v21 = vpop.permute.xlu2 %78 }
  0x7a   :  { %108 = vst.msk [vmem:[%s239_s1 + $0x10] sm:$0xff] %vm104_vm0, %v61_v20 }
  0x7b   :  { %117 = vst.msk [vmem:[%s239_s1 + $0x58] sm:$0xf] %vm106_vm1, %v79_v21 }
  0x80   :  { %v59_v22 = vpop.permute.xlu0 %58  ;;  %v63_v23 = vpop.permute.xlu1 %62 }
  0x81   :  { %107 = vst.msk [vmem:[%s239_s1 + $0x8] sm:$0xf] %vm106_vm1, %v59_v22  ;;  %v85_v24 = vpop.permute.xlu2 %84 }
  0x82   :  { %109 = vst.msk [vmem:[%s239_s1 + $0x18] sm:$0xf] %vm106_vm1, %v63_v23 }
  0x83   :  { %120 = vst.msk [vmem:[%s239_s1 + $0x70] sm:$0xff] %vm104_vm0, %v85_v24 }
  0x88   :  { %v69_v25 = vpop.permute.xlu0 %68  ;;  %v71_v26 = vpop.permute.xlu1 %70 }
  0x89   :  { %112 = vst.msk [vmem:[%s239_s1 + $0x30] sm:$0xff] %vm104_vm0, %v69_v25 }
  0x8a   :  { %113 = vst.msk [vmem:[%s239_s1 + $0x38] sm:$0xf] %vm106_vm1, %v71_v26 }
  0x90   :  { %v75_v27 = vpop.permute.xlu0 %74  ;;  %v77_v28 = vpop.permute.xlu1 %76 }
  0x91   :  { %115 = vst.msk [vmem:[%s239_s1 + $0x48] sm:$0xf] %vm106_vm1, %v75_v27 }
  0x92   :  { %116 = vst.msk [vmem:[%s239_s1 + $0x50] sm:$0xff] %vm104_vm0, %v77_v28 }
  0x98   :  { %v81_v29 = vpop.permute.xlu0 %80  ;;  %v83_v30 = vpop.permute.xlu1 %82 }
  0x99   :  { %118 = vst.msk [vmem:[%s239_s1 + $0x60] sm:$0xff] %vm104_vm0, %v81_v29 }
  0x9a   :  { %119 = vst.msk [vmem:[%s239_s1 + $0x68] sm:$0xf] %vm106_vm1, %v83_v30 }
  0xa0   :  { %v87_v31 = vpop.permute.xlu0 %86 }
  0xa1   :  { %121 = vst.msk [vmem:[%s239_s1 + $0x78] sm:$0xf] %vm106_vm1, %v87_v31 }
  0xa2   :  { %126 = vsyncpa [#allocation3], 1 }

</bundles_post_ra>
